<compile_context>
chip_gen: v5e
topology: v5e:2x2
jax: 0.10.0
libtpu: 0.0.40
codegen_flags: <defaults>
</compile_context>

<pallas_src>
import math
import numpy as np

import jax
import jax.numpy as jnp
from jax import lax
from jax.experimental import pallas as pl
from jax.experimental.pallas import tpu as pltpu


# ----------------------------- Pallas kernel ------------------------------ #

def make_sa33_kernel():
    def kernel(x_ref, w1_ref, mavg_ref, mmax_ref, bn_ref, o_ref):
        # x_ref   : (TB, C, HW)   lane-dense input tile (HW = H*W)
        # w1_ref  : (C, C)        banded matrix form of conv1 (rows = out channel)
        # mavg_ref: (HW, HW)      dense matrix form of the 7x7 conv, mean-map taps
        # mmax_ref: (HW, HW)      dense matrix form of the 7x7 conv, max-map taps
        # bn_ref  : (2, C)        folded inference BN: [scale; shift]
        # o_ref   : (TB, C, HW)
        x = x_ref[...]                                   # (TB, C, HW) f32

        # ---- channel attention (ECA): GAP + banded conv1 on the VPU ----
        gap = jnp.mean(x, axis=2)                        # (TB, C)   lane reduce
        w1m = w1_ref[...]                                # (C, C)
        # f1[b, co] = sum_ci w1m[co, ci] * gap[b, ci]   (tiny -> VPU + lane reduce,
        # avoids an MXU push for a (C,C)@(C,1) problem)
        f1 = jnp.sum(w1m[None, :, :] * gap[:, None, :], axis=2)   # (TB, C)

        # ---- spatial attention: channel mean / max + dense conv matmuls ----
        avg_map = jnp.mean(x, axis=1)                    # (TB, HW)  sublane reduce
        max_map = jnp.max(x, axis=1)                     # (TB, HW)
        f2 = (jnp.dot(avg_map, mavg_ref[...], preferred_element_type=jnp.float32)
              + jnp.dot(max_map, mmax_ref[...], preferred_element_type=jnp.float32))
        # f2: (TB, HW)

        # ---- inference BN + combine + sigmoid + gate the input ----
        bn = bn_ref[...]                                 # (2, C)
        base = f1 + bn[1][None, :]                       # (TB, C)  F1 + bn shift
        att = jax.nn.sigmoid(base[:, :, None]
                             + bn[0][None, :, None] * f2[:, None, :])  # (TB,C,HW)
        o_ref[...] = (x * att).astype(o_ref.dtype)

    return kernel


def ec_sa33_pallas(x, w1mat, convmat_avg, convmat_max, bn_params, *, num_chunks=None):
    B, C, H, W = x.shape
    HW = H * W
    xf = x.reshape(B, C, HW)                 # lane-dense minor dim (free reshape)

    if num_chunks is None:
        # Split the batch across 2 "parallel" grid steps so both v7x
        # TensorCores get work; on v5e/v6e this is just a 2-iteration loop.
        num_chunks = 2 if (B >= 2 and B % 2 == 0) else 1
    TB = B // num_chunks

    kernel = make_sa33_kernel()
    out = pl.pallas_call(
        kernel,
        out_shape=jax.ShapeDtypeStruct((B, C, HW), x.dtype),
        grid_spec=pltpu.PrefetchScalarGridSpec(
            num_scalar_prefetch=0,
            grid=(num_chunks,),
            in_specs=[
                pl.BlockSpec((TB, C, HW), lambda b: (b, 0, 0)),
                pl.BlockSpec((C, C), lambda b: (0, 0)),
                pl.BlockSpec((HW, HW), lambda b: (0, 0)),
                pl.BlockSpec((HW, HW), lambda b: (0, 0)),
                pl.BlockSpec((2, C), lambda b: (0, 0)),
            ],
            out_specs=pl.BlockSpec((TB, C, HW), lambda b: (b, 0, 0)),
        ),
        compiler_params=pltpu.CompilerParams(
            dimension_semantics=("parallel",)),
    )(xf, w1mat, convmat_avg, convmat_max, bn_params)
    return out.reshape(B, C, H, W)


# --------------------------- host-side glue -------------------------------- #

def conv1_to_matrix(w1, C, k1):
    """Expand the (k1,) Conv1d(1,1,k1,pad=k1//2) weight applied along the
    channel axis into a (C, C) banded matrix with rows = output channel:
    F1[b, co] = sum_ci mat[co, ci] * gap[b, ci]."""
    p1 = k1 // 2
    co = np.arange(C)[:, None]
    ci = np.arange(C)[None, :]
    t = ci - co + p1
    valid = (t >= 0) & (t < k1)
    w1 = np.asarray(w1, np.float32)
    mat = np.where(valid, w1[np.clip(t, 0, k1 - 1)], 0.0).astype(np.float32)
    return jnp.asarray(mat)


def conv2_to_matrices(w2, H, W, pad):
    """Expand the Conv2d(2, 1, k, padding=pad, bias=False) weight into two
    dense (H*W, H*W) matrices (M_avg, M_max) so that
        f2_flat = avg_flat @ M_avg + max_flat @ M_max
    reproduces the zero-padded 2-D cross-correlation."""
    w2 = np.asarray(w2, np.float32)          # (1, 2, k, k)
    k = w2.shape[-1]
    HW = H * W
    mats = [np.zeros((HW, HW), np.float32) for _ in range(2)]
    oh, ow = np.meshgrid(np.arange(H), np.arange(W), indexing="ij")
    o_idx = (oh * W + ow).ravel()
    for ch in range(2):
        M = mats[ch]
        for ky in range(k):
            for kx in range(k):
                ih = (oh + ky - pad).ravel()
                iw = (ow + kx - pad).ravel()
                ok = (ih >= 0) & (ih < H) & (iw >= 0) & (iw < W)
                i_idx = ih[ok] * W + iw[ok]
                M[i_idx, o_idx[ok]] = w2[0, ch, ky, kx]
    return jnp.asarray(mats[0]), jnp.asarray(mats[1])


def fold_bn(gamma, beta, mean, var, eps=1e-5):
    """Fold inference-mode BatchNorm2d into per-channel scale/shift: (2, C)."""
    gamma = np.asarray(gamma, np.float32)
    beta = np.asarray(beta, np.float32)
    mean = np.asarray(mean, np.float32)
    var = np.asarray(var, np.float32)
    scale = gamma / np.sqrt(var + eps)
    shift = beta - mean * scale
    return jnp.asarray(np.stack([scale, shift], axis=0).astype(np.float32))


# --------------------------- pure-JAX reference ---------------------------- #

def ec_sa33_ref(x, w1, w2, bn_w, bn_b, bn_mean, bn_var, p2, eps=1e-5):
    B, C, H, W = x.shape
    k1 = w1.shape[0]
    p1 = k1 // 2

    gap = x.mean(axis=(2, 3))                                  # (B, C)
    gp = jnp.pad(gap, ((0, 0), (p1, p1)))
    F1 = jnp.zeros((B, C), jnp.float32)
    for t in range(k1):
        F1 = F1 + w1[t] * gp[:, t:t + C]

    avg_out = x.mean(axis=1, keepdims=True)                    # (B, 1, H, W)
    max_out = x.max(axis=1, keepdims=True)                     # (B, 1, H, W)
    f2in = jnp.concatenate([avg_out, max_out], axis=1)         # (B, 2, H, W)
    f2 = lax.conv_general_dilated(
        f2in, w2, window_strides=(1, 1),
        padding=((p2, p2), (p2, p2)),
        dimension_numbers=("NCHW", "OIHW", "NCHW"))            # (B, 1, H, W)

    scale = bn_w / jnp.sqrt(bn_var + eps)
    shift = bn_b - bn_mean * scale
    F2 = scale[None, :, None, None] * f2 + shift[None, :, None, None]
    F = jax.nn.sigmoid(F1[:, :, None, None] + F2)
    return x * F


# --------------------------------- main ------------------------------------ #

if __name__ == "__main__":
    # Module hyper-params (mirrors EC_SA33.__init__ with channel=16, kernel=7)
    B, C, H, W = 2, 16, 16, 16
    kernel_sz = 7
    gamma, bconst = 2, 1
    k1 = int(abs((math.log(C, 2) + bconst) / gamma))
    k1 = k1 if k1 % 2 else k1 + 1          # -> 3 for C=16
    p2 = 3 if kernel_sz == 7 else 1

    key = jax.random.PRNGKey(0)
    kx, kw1, kw2, kg, kb, km, kv = jax.random.split(key, 7)

    x = jax.random.normal(kx, (B, C, H, W), jnp.float32)
    # conv1: nn.Conv1d(1, 1, k1, bias=False) -> weight (1, 1, k1) -> (k1,)
    w1 = jax.random.normal(kw1, (k1,), jnp.float32) / math.sqrt(k1)
    # conv2: nn.Conv2d(2, 1, 7, padding=3, bias=False) -> (1, 2, 7, 7)
    w2 = (jax.random.normal(kw2, (1, 2, kernel_sz, kernel_sz), jnp.float32)
          / math.sqrt(2 * kernel_sz * kernel_sz))
    # BatchNorm2d(C) inference parameters
    bn_w = 1.0 + 0.1 * jax.random.normal(kg, (C,), jnp.float32)
    bn_b = 0.1 * jax.random.normal(kb, (C,), jnp.float32)
    bn_mean = 0.1 * jax.random.normal(km, (C,), jnp.float32)
    bn_var = 1.0 + 0.5 * jax.random.uniform(kv, (C,), jnp.float32)

    w1mat = conv1_to_matrix(np.asarray(w1), C, k1)
    convmat_avg, convmat_max = conv2_to_matrices(np.asarray(w2), H, W, p2)
    bn_params = fold_bn(np.asarray(bn_w), np.asarray(bn_b),
                        np.asarray(bn_mean), np.asarray(bn_var))

    out = jax.block_until_ready(
        ec_sa33_pallas(x, w1mat, convmat_avg, convmat_max, bn_params))
    ref = jax.block_until_ready(
        ec_sa33_ref(x, w1, w2, bn_w, bn_b, bn_mean, bn_var, p2))

    assert out.shape == (B, C, H, W)
    err = float(jnp.max(jnp.abs(out - ref)))
    assert jnp.allclose(out, ref, atol=1e-4, rtol=1e-4), err

    print("KERNEL_OK")
</pallas_src>

<mosaic_0001>
module attributes {stable_mosaic.version = 11 : i64} {
  func.func @kernel(%arg0: i32, %arg1: memref<1x16x256xf32, #tpu.memory_space<vmem>>, %arg2: memref<16x16xf32, #tpu.memory_space<vmem>>, %arg3: memref<256x256xf32, #tpu.memory_space<vmem>>, %arg4: memref<256x256xf32, #tpu.memory_space<vmem>>, %arg5: memref<2x16xf32, #tpu.memory_space<vmem>>, %arg6: memref<1x16x256xf32, #tpu.memory_space<vmem>>) attributes {dimension_semantics = [#tpu.dimension_semantics<parallel>], iteration_bounds = array<i64: 2>, scalar_prefetch = 0 : i64, scratch_operands = 0 : i64, tpu.core_type = #tpu.core_type<tc>, window_params = [{transform_indices = @transform_0, window_bounds = array<i64: 1, 16, 256>}, {pipeline_mode = #tpu.pipeline_mode<synchronous>, transform_indices = @transform_1, window_bounds = array<i64: 16, 16>}, {pipeline_mode = #tpu.pipeline_mode<synchronous>, transform_indices = @transform_2, window_bounds = array<i64: 256, 256>}, {pipeline_mode = #tpu.pipeline_mode<synchronous>, transform_indices = @transform_3, window_bounds = array<i64: 256, 256>}, {pipeline_mode = #tpu.pipeline_mode<synchronous>, transform_indices = @transform_4, window_bounds = array<i64: 2, 16>}, {transform_indices = @transform_5, window_bounds = array<i64: 1, 16, 256>}]} {
    %c0 = arith.constant 0 : index
    %c0_0 = arith.constant 0 : index
    %c0_1 = arith.constant 0 : index
    %0 = vector.load %arg1[%c0, %c0_0, %c0_1] : memref<1x16x256xf32, #tpu.memory_space<vmem>>, vector<1x16x256xf32>
    %cst = arith.constant dense<0.000000e+00> : vector<1x16xf32>
    %1 = vector.multi_reduction <add>, %0, %cst [2] : vector<1x16x256xf32> to vector<1x16xf32>
    %cst_2 = arith.constant 2.560000e+02 : f32
    %2 = vector.broadcast %cst_2 : f32 to vector<1x16xf32>
    %3 = arith.divf %1, %2 : vector<1x16xf32>
    %c0_3 = arith.constant 0 : index
    %c0_4 = arith.constant 0 : index
    %4 = vector.load %arg2[%c0_3, %c0_4] : memref<16x16xf32, #tpu.memory_space<vmem>>, vector<16x16xf32>
    %5 = vector.shape_cast %4 : vector<16x16xf32> to vector<1x16x16xf32>
    %6 = vector.shape_cast %3 : vector<1x16xf32> to vector<1x1x16xf32>
    %7 = vector.broadcast %6 : vector<1x1x16xf32> to vector<1x16x16xf32>
    %8 = arith.mulf %5, %7 : vector<1x16x16xf32>
    %cst_5 = arith.constant dense<0.000000e+00> : vector<1x16xf32>
    %9 = vector.multi_reduction <add>, %8, %cst_5 [2] : vector<1x16x16xf32> to vector<1x16xf32>
    %cst_6 = arith.constant dense<0.000000e+00> : vector<1x256xf32>
    %10 = vector.multi_reduction <add>, %0, %cst_6 [1] : vector<1x16x256xf32> to vector<1x256xf32>
    %cst_7 = arith.constant 1.600000e+01 : f32
    %11 = vector.broadcast %cst_7 : f32 to vector<1x256xf32>
    %12 = arith.divf %10, %11 : vector<1x256xf32>
    %cst_8 = arith.constant dense<0xFF800000> : vector<1x256xf32>
    %13 = vector.multi_reduction <maximumf>, %0, %cst_8 [1] : vector<1x16x256xf32> to vector<1x256xf32>
    %c0_9 = arith.constant 0 : index
    %c0_10 = arith.constant 0 : index
    %14 = vector.load %arg3[%c0_9, %c0_10] : memref<256x256xf32, #tpu.memory_space<vmem>>, vector<256x256xf32>
    %cst_11 = arith.constant dense<0.000000e+00> : vector<1x256xf32>
    %15 = tpu.matmul %12, %14, %cst_11 {dimension_numbers = #tpu.dot_dimension_numbers<[1], [0], [0], [1], [0, 0, 1, 1], [], []>} : vector<1x256xf32>, vector<256x256xf32>, vector<1x256xf32> -> vector<1x256xf32>
    %c0_12 = arith.constant 0 : index
    %c0_13 = arith.constant 0 : index
    %16 = vector.load %arg4[%c0_12, %c0_13] : memref<256x256xf32, #tpu.memory_space<vmem>>, vector<256x256xf32>
    %cst_14 = arith.constant dense<0.000000e+00> : vector<1x256xf32>
    %17 = tpu.matmul %13, %16, %cst_14 {dimension_numbers = #tpu.dot_dimension_numbers<[1], [0], [0], [1], [0, 0, 1, 1], [], []>} : vector<1x256xf32>, vector<256x256xf32>, vector<1x256xf32> -> vector<1x256xf32>
    %18 = arith.addf %15, %17 : vector<1x256xf32>
    %c0_15 = arith.constant 0 : index
    %c0_16 = arith.constant 0 : index
    %19 = vector.load %arg5[%c0_15, %c0_16] : memref<2x16xf32, #tpu.memory_space<vmem>>, vector<2x16xf32>
    %20 = vector.extract_strided_slice %19 {offsets = [1, 0], sizes = [1, 16], strides = [1, 1]} : vector<2x16xf32> to vector<1x16xf32>
    %21 = vector.shape_cast %20 : vector<1x16xf32> to vector<16xf32>
    %22 = vector.shape_cast %21 : vector<16xf32> to vector<1x16xf32>
    %23 = arith.addf %9, %22 : vector<1x16xf32>
    %24 = vector.shape_cast %23 : vector<1x16xf32> to vector<1x16x1xf32>
    %25 = vector.extract_strided_slice %19 {offsets = [0, 0], sizes = [1, 16], strides = [1, 1]} : vector<2x16xf32> to vector<1x16xf32>
    %26 = vector.shape_cast %25 : vector<1x16xf32> to vector<16xf32>
    %27 = vector.shape_cast %26 : vector<16xf32> to vector<1x16x1xf32>
    %28 = vector.shape_cast %18 : vector<1x256xf32> to vector<1x1x256xf32>
    %29 = vector.broadcast %27 : vector<1x16x1xf32> to vector<1x16x256xf32>
    %30 = vector.broadcast %28 : vector<1x1x256xf32> to vector<1x16x256xf32>
    %31 = arith.mulf %29, %30 : vector<1x16x256xf32>
    %32 = vector.broadcast %24 : vector<1x16x1xf32> to vector<1x16x256xf32>
    %33 = arith.addf %32, %31 : vector<1x16x256xf32>
    %34 = arith.negf %33 : vector<1x16x256xf32>
    %35 = math.exp %34 : vector<1x16x256xf32>
    %cst_17 = arith.constant 1.000000e+00 : f32
    %36 = vector.broadcast %cst_17 : f32 to vector<1x16x256xf32>
    %37 = arith.addf %36, %35 : vector<1x16x256xf32>
    %38 = arith.divf %36, %37 : vector<1x16x256xf32>
    %39 = arith.mulf %0, %38 : vector<1x16x256xf32>
    %c0_18 = arith.constant 0 : index
    %c0_19 = arith.constant 0 : index
    %c0_20 = arith.constant 0 : index
    %40 = vector.load %arg6[%c0_18, %c0_19, %c0_20] : memref<1x16x256xf32, #tpu.memory_space<vmem>>, vector<1x16x256xf32>
    tpu.vector_store %arg6[%c0_18, %c0_19, %c0_20], %39 {strides = array<i32>} : memref<1x16x256xf32, #tpu.memory_space<vmem>>, vector<1x16x256xf32>,
    return
  }
  func.func @transform_0(%arg0: i32) -> (i32, i32, i32) {
    %c0_i32 = arith.constant 0 : i32
    %c0_i32_0 = arith.constant 0 : i32
    %c0_i32_1 = arith.constant 0 : i32
    return %arg0, %c0_i32, %c0_i32_0 : i32, i32, i32
  }
  func.func @transform_1(%arg0: i32) -> (i32, i32) {
    %c0_i32 = arith.constant 0 : i32
    %c0_i32_0 = arith.constant 0 : i32
    %c0_i32_1 = arith.constant 0 : i32
    return %c0_i32, %c0_i32_0 : i32, i32
  }
  func.func @transform_2(%arg0: i32) -> (i32, i32) {
    %c0_i32 = arith.constant 0 : i32
    %c0_i32_0 = arith.constant 0 : i32
    %c0_i32_1 = arith.constant 0 : i32
    return %c0_i32, %c0_i32_0 : i32, i32
  }
  func.func @transform_3(%arg0: i32) -> (i32, i32) {
    %c0_i32 = arith.constant 0 : i32
    %c0_i32_0 = arith.constant 0 : i32
    %c0_i32_1 = arith.constant 0 : i32
    return %c0_i32, %c0_i32_0 : i32, i32
  }
  func.func @transform_4(%arg0: i32) -> (i32, i32) {
    %c0_i32 = arith.constant 0 : i32
    %c0_i32_0 = arith.constant 0 : i32
    %c0_i32_1 = arith.constant 0 : i32
    return %c0_i32, %c0_i32_0 : i32, i32
  }
  func.func @transform_5(%arg0: i32) -> (i32, i32, i32) {
    %c0_i32 = arith.constant 0 : i32
    %c0_i32_0 = arith.constant 0 : i32
    %c0_i32_1 = arith.constant 0 : i32
    return %arg0, %c0_i32, %c0_i32_0 : i32, i32, i32
  }
}

</mosaic_0001>

<bundles_post_ra>
// kernel: tpu_custom_call.1
= control target key start
LH: loop header
LB: loop body
LE: loop exit
PB: predicated region body
PF: predicated region fallthrough
CT: control target
= control target key end

     0   :  { %10 = vsyncpa [#allocation3], 0  ;;  %s1527_s0 = inlined_call_operand.hbm [shape: f32[2,16,256], index: 0, kind: input, shape index: {}]   ;;  %s1528_s1 = inlined_call_operand.hbm [shape: f32[16,16], index: 1, kind: input, shape index: {}]   ;;  %s1529_s2 = inlined_call_operand.hbm [shape: f32[256,256], index: 2, kind: input, shape index: {}]   ;;  %s1530_s3 = inlined_call_operand.hbm [shape: f32[256,256], index: 3, kind: input, shape index: {}]   ;;  %s1531_s4 = inlined_call_operand.vmem [shape: f32[2,16], index: 4, kind: input, shape index: {}]   ;;  %s1532_s5 = inlined_call_operand.hbm [shape: f32[2,16,256], index: 5, kind: output, shape index: {}]  }
   0x1   :  { %12 = vsyncpa [#allocation3 + $0x1], 0 }
   0x2   :  { %13 = vsyncpa [#allocation6], 0 }
   0x3   :  { %14 = vsyncpa [#allocation9], 0 }
   0x4   :  { %15 = vsyncpa [#allocation4], 0 }
   0x5   :  { %17 = vsyncpa [#allocation4 + $0x1], 0  ;;  %s1302_s18 = smov 0   ;;  %s1304_s19 = smov 0  }
   0x6   :  { %s1306_s20 = smov 0   ;;  %s1308_s21 = smov 0  }
   0x7 LB: > { %s1323_s22 = sadd.s32 4294967295, %s1258_s21   ;;  %s926_s23 = sadd.s32 4294967294, %s1258_s21   ;;  %s1258_s21 = sphi %s1308_s21, %s1545_s21   ;;  %s1254_s20 = sphi %s1306_s20, %s1544_s20   ;;  %s1250_s19 = sphi %s1304_s19, %s1543_s19   ;;  %s1246_s18 = sphi %s1302_s18, %s1542_s18  }
   0x8   : > { %p43_p0 = scmp.ne.s32.totalorder %s1250_s19, %s1246_s18  ;;  %p44_p1 = scmp.eq.s32.totalorder %s1323_s22, 0 }
   0x9   : > { %p151_p2 = scmp.eq.s32.totalorder %s1323_s22, 1  ;;  %p157_p3 = scmp.eq.s32.totalorder %s926_s23, 1 }
   0xa   : > { %p1332_p4 = por %p44_p1, %p43_p0  ;;  %p927_p5 = scmp.ge.s32.totalorder %s1258_s21, 1 }
   0xb   : > { %p1337_p6 = por %p157_p3, %p43_p0  ;;  %p164_p7 = scmp.lt.s32.totalorder %s1258_s21, 3 }
   0xc   : > { %s175_s28 = sshll.u32 %s1528_s1, 4  ;;  %s1260_s30 = smov [#allocation5]   ;;  %s176_s28 = int_to_ptr.hbm [resolvable:$true] %s175_s28 }
   0xd   : > { %p1345_p8 = pnand %p927_p5, %p164_p7  ;;  %s177_s6 = sshll.u32 %s1260_s30, 4  ;;  %s178_s6 = int_to_ptr.vmem [resolvable:$true] %s177_s6 }
   0xe   : > { %s189_s10 = sshll.u32 %s1529_s2, 4  ;;  %s1261_s11 = smov 128   ;;  %s190_s10 = int_to_ptr.hbm [resolvable:$true] %s189_s10 }
   0xf   : > { %p968_p9 = pneg %p1345_p8  ;;  %s1262_s12 = smov 8  }
  0x10   : > { %s1263_s13 = smov [#allocation7]   ;;  %s1533_s15 = smov 256  }
  0x11   : > { %p1353_p10 = pnand %p968_p9, %p44_p1  ;;  %s191_s14 = sshll.u32 %s1263_s13, 4  ;;  %s192_s14 = int_to_ptr.vmem [resolvable:$true] %s191_s14 }
  0x12   : > { %s1265_s16 = smov 16   ;;  %s203_s26 = sshll.u32 %s1530_s3, 4  ;;  %s204_s26 = int_to_ptr.hbm [resolvable:$true] %s203_s26 }
  0x13   : > { %971 = dma.hbm_to_vmem [thread:$0]  (!%p1353_p10), %s176_s28, 256, %s178_s6, [#allocation6], %s1261_s11, %s1261_s11, %s1262_s12  }
  0x14   : > { %974 = dma.hbm_to_vmem [thread:$0]  (!%p1353_p10), %s190_s10, 8192, %s192_s14, [#allocation6], %s1533_s15, %s1533_s15, %s1265_s16  }
  0x15   : > { %s1266_s27 = smov [#allocation8]   ;;  %s1377_s30 = sadd.s32 1, %s1258_s21  }
  0x16   : > { %s205_s28 = sshll.u32 %s1266_s27, 4  ;;  %s27_s6 = ssub.s32 %s1258_s21, %s1377_s30  ;;  %s206_s28 = int_to_ptr.vmem [resolvable:$true] %s205_s28 }
  0x17   : > { %977 = dma.hbm_to_vmem [thread:$0]  (!%p1353_p10), %s204_s26, 8192, %s206_s28, [#allocation9], %s1533_s15, %s1533_s15, %s1265_s16  }
  0x18   : > { %s30_s8 = sadd.s32 1, %s1254_s20  ;;  %p28_p12 = scmp.eq.s32.totalorder %s27_s6, 0 }
  0x19   : > { %p37_p13 = scmp.ne.s32.totalorder %s1254_s20, %s1250_s19  ;;  %p38_p0 = scmp.eq.s32.totalorder %s1258_s21, 0 }
  0x1a   : > { %s1386_s9 = scalar_select %p28_p12, %s1254_s20, %s30_s8  }
  0x1b   : > { %p1390_p3 = por %p151_p2, %p37_p13  ;;  %p989_p5 = scmp.lt.s32.totalorder %s1258_s21, 2 }
  0x1c   : > { %s222_s7 = sand.u32 1, %s1254_s20   ;;  %s950_s11 = sshll.u32 %s1258_s21, 5 }
  0x1d   : > { %p39_p7 = por %p38_p0, %p37_p13  ;;  %s932_s12 = sshll.u32 %s222_s7, 5 }
  0x1e   : > { %s231_s17 = scalar_lea.hbm %s1527_s0, %s950_s11  ;;  %s226_s26 = scalar_lea.vmem [#allocation2], %s932_s12 }
  0x1f   : > { %s232_s23 = sshll.u32 %s231_s17, 4  ;;  %s234_s27 = sshll.u32 %s226_s26, 4  ;;  %s233_s23 = int_to_ptr.hbm [resolvable:$true] %s232_s23  ;;  %s235_s27 = int_to_ptr.vmem [resolvable:$true] %s234_s27 }
  0x20   : > { %p1400_p9 = pnand %p989_p5, %p39_p7  ;;  %s223_s6 = scalar_lea.sflag [#allocation3], %s222_s7 }
  0x21   : > { %s1154_s8 = sshra.s32 %s233_s23, 4  ;;  %s1161_s12 = scalar_lea.hbm %s1527_s0, 64  ;;  %s1155_s8 = int_to_ptr.hbm [resolvable:$true] %s1154_s8 }
  0x22   : > { %s1156_s15 = scalar_lea.hbm %s1155_s8, 32  ;;  %p1158_p10 = pneg %p1400_p9 }
  0x23   : > { %p1157_p2 = scmp.ne.s32.totalorder %s1155_s8, %s1156_s15  ;;  %p1162_p0 = scmp.lt.s32.totalorder %s1155_s8, %s1527_s0 }
  0x24   : > { %p1163_p5 = scmp.lt.s32.totalorder %s1161_s12, %s1156_s15 }
  0x25   : > { %p1159_p12 = pnand %p1158_p10, %p1157_p2 }
  0x26   : > { %p1164_p7 = por %p1163_p5, %p1162_p0 }
  0x27   : > { %p1160_p13 = pneg %p1159_p12 }
  0x29   : > { %p1165_p11 = pnand %p1164_p7, %p1160_p13 }
  0x2b   : > { %1168 = shalt.err (!%p1165_p11)
}
  0x2c   : > { %s1540_s7 = smov 256   ;;  %246 = sbr.rel (%p1345_p8) target bundleno = 445 (0x1bd), region = 40 }
  0x2d   : > { %981 = dma.hbm_to_vmem [thread:$0]  (!%p1400_p9), %s233_s23, 512, %s235_s27, %s223_s6, %s1540_s7, %s1540_s7, %s1265_s16  }
  0x2e   : > { %s1420_s26 = sand.u32 (!%p1345_p8), 1, %s1250_s19  }
  0x2f   : > { %s936_s15 = sshll.u32 (!%p1345_p8), %s1420_s26, 5  ;;  %s249_s8 = scalar_lea.sflag (!%p1345_p8), [#allocation3], %s1420_s26 }
  0x30   : > { %s252_s11 = scalar_lea.vmem (!%p1345_p8), [#allocation2], %s936_s15 }
  0x31   : > { %1229 = dma.done.wait (%p1332_p4), %s249_s8, 512  }
  0x32   : > { %1231 = vsyncadd (%p1332_p4), %s249_s8, 4294966784 }
  0x33   : > { %1233 = dma.done.wait (%p44_p1), [#allocation6], 8448  }
  0x34   : > { %1235 = vsyncadd (%p44_p1), [#allocation6], 4294958848 }
  0x35   : > { %1237 = dma.done.wait (%p44_p1), [#allocation9], 8192  }
  0x36   : > { %1239 = vsyncadd (%p44_p1), [#allocation9], 4294959104  ;;  %v1438_v0 = vld [vmem:[%s252_s11] sm:$0xff]  ;;  %v1440_v1 = vld [vmem:[%s252_s11 + $0x8] sm:$0xff]  ;;  %v1267_v6 = vmov 256.0   ;;  %v318_v10 = vlaneseq  ;;  %vm323_vm1 = vcmask 130112  }
  0x37   : > { %v299_v2 = vadd.f32 %v1440_v1, %v1438_v0  ;;  %v1444_v3 = vld [vmem:[%s252_s11 + $0x10] sm:$0xff]  ;;  %v1446_v4 = vld [vmem:[%s252_s11 + $0x18] sm:$0xff]  ;;  %1044 = vrcp.f32 %v1267_v6  ;;  %v479_v8 = vld [vmem:[#allocation8 + $0xf8] sm:$0xff]  ;;  %vm340_vm2 = vcmask 130048   ;;  %s951_s16 = sshll.u32 %s1323_s22, 5  ;;  %s294_s23 = scalar_lea.vmem [#allocation10], %s936_s15 }
  0x38   : > { %v302_v5 = vadd.f32 %v1446_v4, %v1444_v3  ;;  %552 = vmatpush.msra.mxu2 %v479_v8  ;;  %v1450_v12 = vshrl.u32 %v318_v10, 7  ;;  %v477_v13 = vld [vmem:[#allocation8 + $0xe8] sm:$0xff]  ;;  %v511_v14 = vld [vmem:[#allocation8 + $0x1f8] sm:$0xff]  ;;  %v478_v17 = vld [vmem:[#allocation8 + $0xf0] sm:$0xff]  ;;  %v319_v45 = vand.u32 127, %v318_v10  ;;  %s820_s6 = scalar_lea.hbm %s1532_s5, %s951_s16  ;;  %s821_s22 = sshll.u32 %s294_s23, 4  ;;  %s822_s22 = int_to_ptr.vmem [resolvable:$true] %s821_s22 }
  0x39   : > { %300 = vadd.xlane.f32.xlu0 %v299_v2  ;;  %v475_v15 = vld [vmem:[#allocation8 + $0xd8] sm:$0xff]  ;;  %v509_v16 = vld [vmem:[#allocation8 + $0x1e8] sm:$0xff]  ;;  %572 = vmatpush.msra.mxu3 %v511_v14  ;;  %v476_v19 = vld [vmem:[#allocation8 + $0xe0] sm:$0xff]  ;;  %s823_s13 = sshll.u32 %s820_s6, 4  ;;  %s809_s12 = scalar_lea.sflag [#allocation4], %s1420_s26  ;;  %s824_s13 = int_to_ptr.hbm [resolvable:$true] %s823_s13 }
  0x3a   : > { %1038 = vset.pattern.permute.xlu2 %v1450_v12  ;;  %553 = vmatpush.msra.mxu2 %v477_v13  ;;  %v473_v18 = vld [vmem:[#allocation8 + $0xc8] sm:$0xff]  ;;  %v510_v20 = vld [vmem:[#allocation8 + $0x1f0] sm:$0xff]  ;;  %v507_v22 = vld [vmem:[#allocation8 + $0x1d8] sm:$0xff]  ;;  %v1462_v49 = vadd.s32 8, %v1450_v12  ;;  %v321_v52 = vadd.s32 4294967288, %v319_v45  ;;  %s1198_s14 = sshra.s32 %s824_s13, 4  ;;  %s1199_s14 = int_to_ptr.hbm [resolvable:$true] %s1198_s14 }
  0x3b   : > { %512 = vmatpush.msra.mxu0 %v478_v17  ;;  %532 = vmatpush.msra.mxu1 %v510_v20  ;;  %v1456_v23 = vld [vmem:[%s1531_s4] sm:$0x3]  ;;  %v471_v24 = vld [vmem:[#allocation8 + $0xb8] sm:$0xff]  ;;  %v508_v26 = vld [vmem:[#allocation8 + $0x1e0] sm:$0xff]  ;;  %s1200_s17 = scalar_lea.hbm %s1199_s14, 32  ;;  %s1204_s8 = scalar_lea.hbm %s1532_s5, 64 }
  0x3c   : > { %554 = vmatpush.msra.mxu2 %v475_v15  ;;  %573 = vmatpush.msra.mxu3 %v509_v16  ;;  %v474_v25 = vld [vmem:[#allocation8 + $0xd0] sm:$0xff]  ;;  %v505_v27 = vld [vmem:[#allocation8 + $0x1c8] sm:$0xff]  ;;  %v674_v28 = vperm.slane %v1456_v23, 1  ;;  %v472_v29 = vld [vmem:[#allocation8 + $0xc0] sm:$0xff]  ;;  %p1201_p1 = scmp.ne.s32.totalorder %s1199_s14, %s1200_s17  ;;  %p1205_p11 = scmp.lt.s32.totalorder %s1199_s14, %s1532_s5 }
  0x3d   : > { %v1045_v7 = vpop.eup %1044  ;;  %513 = vmatpush.msra.mxu0 %v476_v19  ;;  %533 = vmatpush.msra.mxu1 %v508_v26  ;;  %v506_v30 = vld [vmem:[#allocation8 + $0x1d0] sm:$0xff]  ;;  %v469_v31 = vld [vmem:[#allocation8 + $0xa8] sm:$0xff]  ;;  %v503_v34 = vld [vmem:[#allocation8 + $0x1b8] sm:$0xff]  ;;  %p1206_p9 = scmp.lt.s32.totalorder %s1204_s8, %s1200_s17 }
  0x3e   : > { %v306_v9 = vmul.f32 256.0, %v1045_v7  ;;  %555 = vmatpush.msra.mxu2 %v473_v18  ;;  %574 = vmatpush.msra.mxu3 %v507_v22  ;;  %v470_v35 = vld [vmem:[#allocation8 + $0xb0] sm:$0xff]  ;;  %vm310_vm0 = vweird.f32 %v1045_v7  ;;  %v467_v36 = vld [vmem:[#allocation8 + $0x98] sm:$0xff]  ;;  %v504_v37 = vld [vmem:[#allocation8 + $0x1c0] sm:$0xff]  ;;  %p1202_p4 = pnand %p1201_p1, %p1390_p3 }
  0x3f   : > { %514 = vmatpush.msra.mxu0 %v474_v25  ;;  %534 = vmatpush.msra.mxu1 %v506_v30  ;;  %v501_v38 = vld [vmem:[#allocation8 + $0x1a8] sm:$0xff]  ;;  %v468_v39 = vld [vmem:[#allocation8 + $0xa0] sm:$0xff]  ;;  %v502_v41 = vld [vmem:[#allocation8 + $0x1b0] sm:$0xff]  ;;  %p1207_p2 = por %p1206_p9, %p1205_p11 }
  0x40   : > { %v307_v11 = vsub.f32 1.0, %v306_v9  ;;  %556 = vmatpush.msra.mxu2 %v471_v24  ;;  %575 = vmatpush.msra.mxu3 %v505_v27  ;;  %v465_v40 = vld [vmem:[#allocation8 + $0x88] sm:$0xff]  ;;  %v499_v43 = vld [vmem:[#allocation8 + $0x198] sm:$0xff]  ;;  %v466_v44 = vld [vmem:[#allocation8 + $0x90] sm:$0xff]  ;;  %p1203_p8 = pneg %p1202_p4 }
  0x41   : > { %303 = vadd.xlane.f32.xlu0 %v302_v5  ;;  %515 = vmatpush.msra.mxu0 %v472_v29  ;;  %v463_v46 = vld [vmem:[#allocation8 + $0x78] sm:$0xff]  ;;  %v500_v47 = vld [vmem:[#allocation8 + $0x1a0] sm:$0xff]  ;;  %v497_v48 = vld [vmem:[#allocation8 + $0x188] sm:$0xff] }
  0x42   : > { %v308_v21 = vmul.f32 %v1045_v7, %v307_v11  ;;  %679 = vperm.xlu2 %1038, %v674_v28   ;;  %557 = vmatpush.msra.mxu2 %v469_v31  ;;  %v464_v50 = vld [vmem:[#allocation8 + $0x80] sm:$0xff]  ;;  %v461_v53 = vld [vmem:[#allocation8 + $0x68] sm:$0xff]  ;;  %v495_v55 = vld [vmem:[#allocation8 + $0x178] sm:$0xff]  ;;  %v370_v31 = vmax.f32 %v1438_v0, %v1444_v3  ;;  %p1208_p10 = pnand %p1207_p2, %p1203_p8 }
  0x43   : > { %576 = vmatpush.msra.mxu3 %v503_v34  ;;  %516 = vmatpush.msra.mxu0 %v470_v35  ;;  %v498_v56 = vld [vmem:[#allocation8 + $0x190] sm:$0xff]  ;;  %v459_v58 = vld [vmem:[#allocation8 + $0x58] sm:$0xff]  ;;  %v493_v60 = vld [vmem:[#allocation8 + $0x168] sm:$0xff] }
  0x44   : > { %v309_v32 = vadd.f32 %v1045_v7, %v308_v21  ;;  %558 = vmatpush.msra.mxu2 %v467_v36  ;;  %535 = vmatpush.msra.mxu1 %v504_v37  ;;  %v462_v59 = vld [vmem:[#allocation8 + $0x70] sm:$0xff]  ;;  %v496_v61 = vld [vmem:[#allocation8 + $0x180] sm:$0xff]  ;;  %v457_v5 = vld [vmem:[#allocation8 + $0x48] sm:$0xff]  ;;  %v377_v36 = vmax.f32 %v1440_v1, %v1446_v4 }
  0x45   : > { %577 = vmatpush.msra.mxu3 %v501_v38  ;;  %517 = vmatpush.msra.mxu0 %v468_v39  ;;  %v314_v2 = vld [vmem:[#allocation5] sm:$0xff]  ;;  %v460_v6 = vld [vmem:[#allocation8 + $0x60] sm:$0xff]  ;;  %v455_v10 = vld [vmem:[#allocation8 + $0x38] sm:$0xff] }
  0x46   : > { %v311_v42 = vsel %vm310_vm0, %v1045_v7, %v309_v32  ;;  %559 = vmatpush.msra.mxu2 %v465_v40  ;;  %536 = vmatpush.msra.mxu1 %v502_v41  ;;  %v491_v7 = vld [vmem:[#allocation8 + $0x158] sm:$0xff]  ;;  %v494_v8 = vld [vmem:[#allocation8 + $0x170] sm:$0xff]  ;;  %v489_v14 = vld [vmem:[#allocation8 + $0x148] sm:$0xff]  ;;  %v371_v40 = vrot.slane %v370_v31, 4 }
  0x47   : > { %578 = vmatpush.msra.mxu3 %v499_v43  ;;  %518 = vmatpush.msra.mxu0 %v466_v44  ;;  %v458_v11 = vld [vmem:[#allocation8 + $0x50] sm:$0xff]  ;;  %v492_v15 = vld [vmem:[#allocation8 + $0x160] sm:$0xff]  ;;  %v453_v17 = vld [vmem:[#allocation8 + $0x28] sm:$0xff]  ;;  %v347_v43 = vadd.f32 %v1444_v3, %v1438_v0 }
  0x48   : > { %560 = vmatpush.msra.mxu2 %v463_v46  ;;  %537 = vmatpush.msra.mxu1 %v500_v47  ;;  %v487_v18 = vld [vmem:[#allocation8 + $0x138] sm:$0xff]  ;;  %v456_v20 = vld [vmem:[#allocation8 + $0x40] sm:$0xff]  ;;  %v490_v21 = vld [vmem:[#allocation8 + $0x150] sm:$0xff] }
  0x49   : > { %579 = vmatpush.msra.mxu3 %v497_v48  ;;  %519 = vmatpush.msra.mxu0 %v464_v50  ;;  %v315_v19 = vld [vmem:[#allocation5 + $0x8] sm:$0xff]  ;;  %v485_v24 = vld [vmem:[#allocation8 + $0x128] sm:$0xff]  ;;  %v454_v25 = vld [vmem:[#allocation8 + $0x30] sm:$0xff]  ;;  %v378_v48 = vrot.slane %v377_v36, 4  ;;  %v1268_v50 = vmov 16.0  }
  0x4a   : > { %1039 = vset.pattern.permute.xlu2 %v1462_v49  ;;  %561 = vmatpush.msra.mxu2 %v461_v53  ;;  %v451_v22 = vld [vmem:[#allocation8 + $0x18] sm:$0xff]  ;;  %v488_v26 = vld [vmem:[#allocation8 + $0x140] sm:$0xff]  ;;  %v449_v29 = vld [vmem:[#allocation8 + $0x8] sm:$0xff]  ;;  %1046 = vrcp.f32 %v1268_v50  ;;  %v372_v53 = vmax.f32 %v370_v31, %v371_v40 }
  0x4b   : > { %580 = vmatpush.msra.mxu3 %v495_v55  ;;  %538 = vmatpush.msra.mxu1 %v498_v56  ;;  %v483_v30 = vld [vmem:[#allocation8 + $0x118] sm:$0xff]  ;;  %v481_v34 = vld [vmem:[#allocation8 + $0x108] sm:$0xff]  ;;  %v450_v39 = vld [vmem:[#allocation8 + $0x10] sm:$0xff] }
  0x4c   : > { %562 = vmatpush.msra.mxu2 %v459_v58  ;;  %520 = vmatpush.msra.mxu0 %v462_v59  ;;  %v415_v32 = vld [vmem:[#allocation7 + $0xf8] sm:$0xff]  ;;  %v413_v35 = vld [vmem:[#allocation7 + $0xe8] sm:$0xff]  ;;  %v484_v41 = vld [vmem:[#allocation8 + $0x120] sm:$0xff] }
  0x4d   : > { %581 = vmatpush.msra.mxu3 %v493_v60  ;;  %539 = vmatpush.msra.mxu1 %v496_v61  ;;  %v447_v38 = vld [vmem:[#allocation7 + $0x1f8] sm:$0xff]  ;;  %v445_v44 = vld [vmem:[#allocation7 + $0x1e8] sm:$0xff]  ;;  %v482_v46 = vld [vmem:[#allocation8 + $0x110] sm:$0xff] }
  0x4e   : > { %563 = vmatpush.msra.mxu2 %v457_v5  ;;  %521 = vmatpush.msra.mxu0 %v460_v6  ;;  %v414_v47 = vld [vmem:[#allocation7 + $0xf0] sm:$0xff]  ;;  %v480_v55 = vld [vmem:[#allocation8 + $0x100] sm:$0xff]  ;;  %v407_v59 = vld [vmem:[#allocation7 + $0xb8] sm:$0xff]  ;;  %v373_v5 = vrot.slane %v372_v53, 2 }
  0x4f   : > { %582 = vmatpush.msra.mxu3 %v491_v7  ;;  %540 = vmatpush.msra.mxu1 %v494_v8  ;;  %v412_v56 = vld [vmem:[#allocation7 + $0xe0] sm:$0xff]  ;;  %v446_v58 = vld [vmem:[#allocation7 + $0x1f0] sm:$0xff]  ;;  %v441_v60 = vld [vmem:[#allocation7 + $0x1c8] sm:$0xff] }
  0x50   : > { %564 = vmatpush.msra.mxu2 %v455_v10  ;;  %522 = vmatpush.msra.mxu0 %v458_v11  ;;  %v410_v61 = vld [vmem:[#allocation7 + $0xd0] sm:$0xff]  ;;  %v1478_v6 = vpop.eup %1046  ;;  %v439_v8 = vld [vmem:[#allocation7 + $0x1b8] sm:$0xff] }
  0x51   : > { %583 = vmatpush.msra.mxu3 %v489_v14  ;;  %541 = vmatpush.msra.mxu1 %v492_v15  ;;  %v442_v10 = vld [vmem:[#allocation7 + $0x1d0] sm:$0xff]  ;;  %v403_v11 = vld [vmem:[#allocation7 + $0x98] sm:$0xff]  ;;  %v437_v14 = vld [vmem:[#allocation7 + $0x1a8] sm:$0xff]  ;;  %vm366_vm3 = vweird.f32 %v1478_v6 }
  0x52   : > { %685 = vperm.xlu2 %1039, %v674_v28   ;;  %565 = vmatpush.msra.mxu2 %v453_v17  ;;  %v486_v28 = vld [vmem:[#allocation8 + $0x130] sm:$0xff]  ;;  %v362_v17 = vmul.f32 16.0, %v1478_v6 }
  0x53   : > { %584 = vmatpush.msra.mxu3 %v487_v18  ;;  %523 = vmatpush.msra.mxu0 %v456_v20  ;;  %v406_v15 = vld [vmem:[#allocation7 + $0xb0] sm:$0xff]  ;;  %v440_v18 = vld [vmem:[#allocation7 + $0x1c0] sm:$0xff]  ;;  %v374_v20 = vmax.f32 %v372_v53, %v373_v5 }
  0x54   : > { %542 = vmatpush.msra.mxu1 %v490_v21  ;;  %566 = vmatpush.msra.mxu2 %v451_v22  ;;  %v435_v21 = vld [vmem:[#allocation7 + $0x198] sm:$0xff]  ;;  %v404_v22 = vld [vmem:[#allocation7 + $0xa0] sm:$0xff]  ;;  %v426_v5 = vld [vmem:[#allocation7 + $0x150] sm:$0xff] }
  0x55   : > { %585 = vmatpush.msra.mxu3 %v485_v24  ;;  %524 = vmatpush.msra.mxu0 %v454_v25  ;;  %v438_v25 = vld [vmem:[#allocation7 + $0x1b0] sm:$0xff] }
  0x56   : > { %543 = vmatpush.msra.mxu1 %v488_v26  ;;  %567 = vmatpush.msra.mxu2 %v449_v29  ;;  %v399_v26 = vld [vmem:[#allocation7 + $0x78] sm:$0xff]  ;;  %v433_v29 = vld [vmem:[#allocation7 + $0x188] sm:$0xff] }
  0x57   : > { %586 = vmatpush.msra.mxu3 %v483_v30  ;;  %v402_v30 = vld [vmem:[#allocation7 + $0x90] sm:$0xff]  ;;  %1040 = vset.pattern.permute.xlu0 %v1450_v12 }
  0x58   : > { %632 = vmatpush.msrb.mxu2 %v415_v32  ;;  %544 = vmatpush.msra.mxu1 %v486_v28  ;;  %v363_v32 = vsub.f32 1.0, %v362_v17  ;;  %v397_v28 = vld [vmem:[#allocation7 + $0x68] sm:$0xff]  ;;  %v388_v17 = vld [vmem:[#allocation7 + $0x20] sm:$0xff] }
  0x59   : > { %587 = vmatpush.msra.mxu3 %v481_v34  ;;  %v375_v34 = vrot.slane %v374_v20, 1  ;;  %1041 = vset.pattern.permute.xlu1 %v1462_v49 }
  0x5a   : > { %633 = vmatpush.msrb.mxu2 %v413_v35  ;;  %545 = vmatpush.msra.mxu1 %v484_v41  ;;  %v431_v35 = vld [vmem:[#allocation7 + $0x178] sm:$0xff]  ;;  %v429_v41 = vld [vmem:[#allocation7 + $0x168] sm:$0xff] }
  0x5b   : > { %652 = vmatpush.msrb.mxu3 %v447_v38  ;;  %v434_v38 = vld [vmem:[#allocation7 + $0x190] sm:$0xff] }
  0x5c   : > { %546 = vmatpush.msra.mxu1 %v482_v46  ;;  %v393_v46 = vld [vmem:[#allocation7 + $0x48] sm:$0xff] }
  0x5d   : > { %653 = vmatpush.msrb.mxu3 %v445_v44  ;;  %v364_v44 = vmul.f32 %v1478_v6, %v363_v32 }
  0x5e   : > { %547 = vmatpush.msra.mxu1 %v480_v55  ;;  %v425_v55 = vld [vmem:[#allocation7 + $0x148] sm:$0xff] }
  0x60   : > { %612 = vmatpush.msrb.mxu1 %v446_v58  ;;  %v394_v58 = vld [vmem:[#allocation7 + $0x50] sm:$0xff] }
  0x9c   : > { %v680_v12 = vpop.permute.xlu2 %679 }
  0xac   : > { %v301_v33 = vpop.xlane.xlu0 %300 }
  0xad   : > { %v312_v51 = vmul.f32 %v311_v42, %v301_v33  ;;  %v452_v33 = vld [vmem:[#allocation8 + $0x20] sm:$0xff] }
  0xae   : > { %525 = vmatpush.msra.mxu0 %v452_v33  ;;  %v436_v33 = vld [vmem:[#allocation7 + $0x1a0] sm:$0xff] }
  0xaf   : > { %v320_v62 = vperm.slane %v312_v51, %v319_v45  ;;  %v448_v45 = vld [vmem:[#allocation8] sm:$0xff]  ;;  %v409_v51 = vld [vmem:[#allocation7 + $0xc8] sm:$0xff] }
  0xb0   : > { %526 = vmatpush.msra.mxu0 %v450_v39  ;;  %v395_v39 = vld [vmem:[#allocation7 + $0x58] sm:$0xff] }
  0xb2   : > { %527 = vmatpush.msra.mxu0 %v448_v45  ;;  %v432_v45 = vld [vmem:[#allocation7 + $0x180] sm:$0xff] }
  0xb4   : > { %v304_v54 = vpop.xlane.xlu0 %303  ;;  %592 = vmatpush.msrb.mxu0 %v414_v47  ;;  %v376_v47 = vmax.f32 %v374_v20, %v375_v34  ;;  %v386_v20 = vld [vmem:[#allocation7 + $0x10] sm:$0xff] }
  0xb5   : > { %v313_v57 = vmul.f32 %v311_v42, %v304_v54  ;;  %v411_v42 = vld [vmem:[#allocation7 + $0xd8] sm:$0xff]  ;;  %v354_v54 = vadd.f32 %v1446_v4, %v1440_v1 }
  0xb6   : > { %634 = vmatpush.msrb.mxu2 %v411_v42  ;;  %593 = vmatpush.msrb.mxu0 %v412_v56  ;;  %v398_v42 = vld [vmem:[#allocation7 + $0x70] sm:$0xff] }
  0xb7   : > { %v322_v63 = vperm.slane %v313_v57, %v321_v52  ;;  %v443_v52 = vld [vmem:[#allocation7 + $0x1d8] sm:$0xff]  ;;  %v348_v57 = vrot.slane %v347_v43, 4  ;;  %v355_v7 = vrot.slane %v354_v54, 4  ;;  %568 = vmatmul.f32.vlgmr.msra.gmra.mxu2 %v376_v47  ;;  %528 = vmatmul.f32.vlgmr.msra.gmra.mxu0 %v376_v47 }
  0xb8   : > { %635 = vmatpush.msrb.mxu2 %v409_v51  ;;  %654 = vmatpush.msrb.mxu3 %v443_v52  ;;  %v396_v51 = vld [vmem:[#allocation7 + $0x60] sm:$0xff]  ;;  %v430_v52 = vld [vmem:[#allocation7 + $0x170] sm:$0xff] }
  0xb9   : > { %v324_v9 = vsel %vm323_vm1, %v322_v63, %v320_v62  ;;  %v379_v62 = vmax.f32 %v377_v36, %v378_v48  ;;  %v444_v63 = vld [vmem:[#allocation7 + $0x1e0] sm:$0xff]  ;;  %594 = vmatpush.msrb.mxu0 %v410_v61  ;;  %v356_v24 = vadd.f32 %v355_v7, %v354_v54  ;;  %v427_v48 = vld [vmem:[#allocation7 + $0x158] sm:$0xff] }
  0xba   : > { %v338_v13 = vmul.f32 %v324_v9, %v314_v2  ;;  %v339_v27 = vmul.f32 %v324_v9, %v315_v19  ;;  %v405_v2 = vld [vmem:[#allocation7 + $0xa8] sm:$0xff]  ;;  %636 = vmatpush.msrb.mxu2 %v407_v59  ;;  %v408_v9 = vld [vmem:[#allocation7 + $0xc0] sm:$0xff]  ;;  %655 = vmatpush.msrb.mxu3 %v441_v60  ;;  %v391_v54 = vld [vmem:[#allocation7 + $0x38] sm:$0xff] }
  0xbb   : > { %613 = vmatpush.msrb.mxu1 %v444_v63  ;;  %595 = vmatpush.msrb.mxu0 %v408_v9  ;;  %v401_v19 = vld [vmem:[#allocation7 + $0x88] sm:$0xff]  ;;  %v400_v36 = vld [vmem:[#allocation7 + $0x80] sm:$0xff]  ;;  %v387_v7 = vld [vmem:[#allocation7 + $0x18] sm:$0xff] }
  0xbc   : > { %v341_v16 = vsel %vm340_vm2, %v338_v13, 0.0  ;;  %v344_v37 = vsel %vm340_vm2, %v339_v27, 0.0  ;;  %v349_v13 = vadd.f32 %v348_v57, %v347_v43  ;;  %637 = vmatpush.msrb.mxu2 %v405_v2  ;;  %656 = vmatpush.msrb.mxu3 %v439_v8  ;;  %v365_v57 = vadd.f32 %v1478_v6, %v364_v44  ;;  %v428_v59 = vld [vmem:[#allocation7 + $0x160] sm:$0xff]  ;;  %v389_v60 = vld [vmem:[#allocation7 + $0x28] sm:$0xff] }
  0xbd   : > { %342 = vadd.xlane.f32.xlu1 %v341_v16  ;;  %v380_v16 = vrot.slane %v379_v62, 2  ;;  %614 = vmatpush.msrb.mxu1 %v442_v10  ;;  %v392_v63 = vld [vmem:[#allocation7 + $0x40] sm:$0xff]  ;;  %v421_v9 = vld [vmem:[#allocation7 + $0x128] sm:$0xff]  ;;  %v390_v10 = vld [vmem:[#allocation7 + $0x30] sm:$0xff] }
  0xbe   : > { %638 = vmatpush.msrb.mxu2 %v403_v11  ;;  %657 = vmatpush.msrb.mxu3 %v437_v14  ;;  %v350_v27 = vrot.slane %v349_v13, 2  ;;  %v367_v8 = vsel %vm366_vm3, %v1478_v6, %v365_v57  ;;  %v424_v11 = vld [vmem:[#allocation7 + $0x140] sm:$0xff]  ;;  %v385_v14 = vld [vmem:[#allocation7 + $0x8] sm:$0xff] }
  0xbf   : > { %596 = vmatpush.msrb.mxu0 %v406_v15  ;;  %615 = vmatpush.msrb.mxu1 %v440_v18  ;;  %v381_v31 = vmax.f32 %v379_v62, %v380_v16  ;;  %v423_v62 = vld [vmem:[#allocation7 + $0x138] sm:$0xff]  ;;  %v422_v18 = vld [vmem:[#allocation7 + $0x130] sm:$0xff]  ;;  %v417_v6 = vld [vmem:[#allocation7 + $0x108] sm:$0xff] }
  0xc0   : > { %639 = vmatpush.msrb.mxu2 %v401_v19  ;;  %658 = vmatpush.msrb.mxu3 %v435_v21  ;;  %v351_v40 = vadd.f32 %v350_v27, %v349_v13  ;;  %v419_v15 = vld [vmem:[#allocation7 + $0x118] sm:$0xff]  ;;  %v420_v21 = vld [vmem:[#allocation7 + $0x120] sm:$0xff]  ;;  %v1269_v27 = vmov 0  }
  0xc1   : > { %597 = vmatpush.msrb.mxu0 %v404_v22  ;;  %616 = vmatpush.msrb.mxu1 %v438_v25  ;;  %v382_v43 = vrot.slane %v381_v31, 1  ;;  %v384_v22 = vld [vmem:[#allocation7] sm:$0xff] }
  0xc2   : > { %640 = vmatpush.msrb.mxu2 %v399_v26  ;;  %659 = vmatpush.msrb.mxu3 %v433_v29  ;;  %v352_v53 = vrot.slane %v351_v40, 1  ;;  %v416_v25 = vld [vmem:[#allocation7 + $0x100] sm:$0xff]  ;;  %v691_v26 = vperm.slane %v1456_v23, 0 }
  0xc3   : > { %598 = vmatpush.msrb.mxu0 %v402_v30  ;;  %617 = vmatpush.msrb.mxu1 %v436_v33  ;;  %v383_v56 = vmax.f32 %v381_v31, %v382_v43  ;;  %v686_v31 = vpop.permute.xlu2 %685 }
  0xc4   : > { %641 = vmatpush.msrb.mxu2 %v397_v28  ;;  %660 = vmatpush.msrb.mxu3 %v431_v35  ;;  %v353_v2 = vadd.f32 %v352_v53, %v351_v40 }
  0xc5   : > { %345 = vadd.xlane.f32.xlu1 %v344_v37  ;;  %v357_v37 = vrot.slane %v356_v24, 2  ;;  %599 = vmatpush.msrb.mxu0 %v400_v36 }
  0xc6   : > { %618 = vmatpush.msrb.mxu1 %v434_v38  ;;  %642 = vmatpush.msrb.mxu2 %v395_v39  ;;  %v368_v16 = vmul.f32 %v367_v8, %v353_v2 }
  0xc7   : > { %v358_v50 = vadd.f32 %v357_v37, %v356_v24  ;;  %661 = vmatpush.msrb.mxu3 %v429_v41  ;;  %600 = vmatpush.msrb.mxu0 %v398_v42  ;;  %v418_v24 = vld [vmem:[#allocation7 + $0x110] sm:$0xff] }
  0xc8   : > { %619 = vmatpush.msrb.mxu1 %v432_v45  ;;  %643 = vmatpush.msrb.mxu2 %v393_v46 }
  0xc9   : > { %662 = vmatpush.msrb.mxu3 %v427_v48  ;;  %601 = vmatpush.msrb.mxu0 %v396_v51  ;;  %v359_v61 = vrot.slane %v358_v50, 1 }
  0xca   : > { %620 = vmatpush.msrb.mxu1 %v430_v52  ;;  %644 = vmatpush.msrb.mxu2 %v391_v54 }
  0xcb   : > { %663 = vmatpush.msrb.mxu3 %v425_v55  ;;  %602 = vmatpush.msrb.mxu0 %v394_v58  ;;  %v360_v13 = vadd.f32 %v359_v61, %v358_v50 }
  0xcc   : > { %588 = vmatmul.f32.vlgmr.msra.gmra.mxu3 %v383_v56  ;;  %621 = vmatpush.msrb.mxu1 %v428_v59 }
  0xcd   : > { %645 = vmatpush.msrb.mxu2 %v389_v60  ;;  %664 = vmatpush.msrb.mxu3 %v423_v62  ;;  %v369_v19 = vmul.f32 %v367_v8, %v360_v13 }
  0xce   : > { %603 = vmatpush.msrb.mxu0 %v392_v63  ;;  %622 = vmatpush.msrb.mxu1 %v426_v5 }
  0xcf   : > { %646 = vmatpush.msrb.mxu2 %v387_v7  ;;  %665 = vmatpush.msrb.mxu3 %v421_v9 }
  0xd0   : > { %604 = vmatpush.msrb.mxu0 %v390_v10  ;;  %623 = vmatpush.msrb.mxu1 %v424_v11 }
  0xd1   : > { %647 = vmatpush.msrb.mxu2 %v385_v14  ;;  %666 = vmatpush.msrb.mxu3 %v419_v15 }
  0xd2   : > { %548 = vmatmul.f32.vlgmr.msra.gmra.mxu1 %v383_v56  ;;  %648 = vmatmul.f32.vlgmr.msrb.gmra.mxu2 %v368_v16 }
  0xd3   : > { %605 = vmatpush.msrb.mxu0 %v388_v17  ;;  %624 = vmatpush.msrb.mxu1 %v422_v18 }
  0xd4   : > { %667 = vmatpush.msrb.mxu3 %v417_v6  ;;  %696 = vperm.xlu0 %1040, %v691_v26  }
  0xd5   : > { %668 = vmatmul.f32.vlgmr.msrb.gmra.mxu3 %v369_v19  ;;  %606 = vmatpush.msrb.mxu0 %v386_v20 }
  0xd6   : > { %625 = vmatpush.msrb.mxu1 %v420_v21  ;;  %1042 = vset.pattern.permute.xlu2 %v1269_v27 }
  0xd7   : > { %607 = vmatpush.msrb.mxu0 %v384_v22 }
  0xd8   : > { %626 = vmatpush.msrb.mxu1 %v418_v24  ;;  %608 = vmatmul.f32.vlgmr.msrb.gmra.mxu0 %v368_v16 }
  0xda   : > { %627 = vmatpush.msrb.mxu1 %v416_v25 }
  0xdb   : > { %628 = vmatmul.f32.vlgmr.msrb.gmra.mxu1 %v369_v19 }
  0xdc   : > { %1043 = vset.pattern.permute.xlu0 %v1269_v27 }
  0xde   : > { %702 = vperm.xlu1 %1041, %v691_v26  }
 0x130   : > { %v343_v29 = vpop.xlane.xlu1 %342 }
 0x131   : > { %v689_v30 = vadd.f32 %v680_v12, %v343_v29 }
 0x133   : > { %712 = vperm.xlu2 %1042, %v689_v30  }
 0x134   : > { %v529_v33 = vpop.f32.mrf.mxu0 }
 0x138   : > { %v346_v32 = vpop.xlane.xlu1 %345 }
 0x139   : > { %v690_v49 = vadd.f32 %v686_v31, %v346_v32 }
 0x13a   : > { %v569_v28 = vpop.f32.mrf.mxu2 }
 0x13b   : > { %717 = vperm.xlu2 %1042, %v690_v49  }
 0x146   : > { %v697_v47 = vpop.permute.xlu0 %696 }
 0x14f   : > { %v549_v23 = vpop.f32.mrf.mxu1  ;;  %v589_v34 = vpop.f32.mrf.mxu3 }
 0x150   : > { %v550_v35 = vadd.f32 %v549_v23, %v529_v33  ;;  %v590_v36 = vadd.f32 %v589_v34, %v569_v28  ;;  %v703_v56 = vpop.permute.xlu1 %702 }
 0x155   : > { %v609_v37 = vpop.f32.mrf.mxu0  ;;  %v649_v38 = vpop.f32.mrf.mxu2 }
 0x156   : > { %v610_v39 = vadd.f32 %v609_v37, %v550_v35  ;;  %v650_v40 = vadd.f32 %v649_v38, %v590_v36 }
 0x158   : > { %v629_v41 = vpop.f32.mrf.mxu1  ;;  %v669_v42 = vpop.f32.mrf.mxu3 }
 0x159   : > { %v630_v43 = vadd.f32 %v629_v41, %v610_v39  ;;  %v670_v44 = vadd.f32 %v669_v42, %v650_v40 }
 0x15b   : > { %v704_v45 = vperm.slane %v630_v43, 0  ;;  %v705_v46 = vperm.slane %v670_v44, 0 }
 0x15d   : > { %v706_v48 = vmul.f32 %v704_v45, %v697_v47  ;;  %v707_v50 = vmul.f32 %v705_v46, %v697_v47  ;;  %v708_v57 = vmul.f32 %v704_v45, %v703_v56  ;;  %v709_v58 = vmul.f32 %v705_v46, %v703_v56 }
 0x18d   : > { %v713_v51 = vpop.permute.xlu2 %712 }
 0x18e   : > { %v720_v52 = vadd.f32 %v713_v51, %v706_v48  ;;  %v721_v53 = vadd.f32 %v713_v51, %v707_v50 }
 0x190   : > { %v941_v54 = vmul.f32 -1.442695, %v720_v52  ;;  %v942_v55 = vmul.f32 -1.442695, %v721_v53 }
 0x192   : > { %1048 = vpow2.f32 %v941_v54 }
 0x193   : > { %1050 = vpow2.f32 %v942_v55 }
 0x195   : > { %v718_v59 = vpop.permute.xlu2 %717 }
 0x196   : > { %v722_v60 = vadd.f32 %v718_v59, %v708_v57  ;;  %v723_v61 = vadd.f32 %v718_v59, %v709_v58 }
 0x198   : > { %v1049_v62 = vpop.eup %1048  ;;  %v943_v63 = vmul.f32 -1.442695, %v722_v60  ;;  %v944_v7 = vmul.f32 -1.442695, %v723_v61 }
 0x199   : > { %v1051_v2 = vpop.eup %1050  ;;  %v736_v5 = vadd.f32 1.0, %v1049_v62 }
 0x19a   : > { %v737_v8 = vadd.f32 1.0, %v1051_v2  ;;  %1052 = vpow2.f32 %v943_v63 }
 0x19b   : > { %1054 = vrcp.f32 %v736_v5  ;;  %v749_v6 = vand.u32 2147483647, %v736_v5  ;;  %v751_v19 = vand.u32 2147483648, %v736_v5  ;;  %vm745_vm6 = vweird.f32 %v736_v5 }
 0x19c   : > { %1056 = vrcp.f32 %v737_v8  ;;  %v766_v22 = vand.u32 2147483648, %v737_v8  ;;  %v764_v25 = vand.u32 2147483647, %v737_v8  ;;  %vm760_vm8 = vweird.f32 %v737_v8 }
 0x19d   : > { %1058 = vpow2.f32 %v944_v7  ;;  %v752_v12 = vor.u32 1.1754944e-38, %v751_v19  ;;  %vm750_vm9 = vcmp.eq.f32.partialorder %v749_v6, 8.507059e+37 }
 0x19e   : > { %v767_v31 = vor.u32 1.1754944e-38, %v766_v22  ;;  %vm765_vm11 = vcmp.eq.f32.partialorder %v764_v25, 8.507059e+37 }
 0x1a0   : > { %v1053_v9 = vpop.eup %1052 }
 0x1a1   : > { %v1055_v10 = vpop.eup %1054  ;;  %v738_v11 = vadd.f32 1.0, %v1053_v9 }
 0x1a2   : > { %v1057_v13 = vpop.eup %1056  ;;  %v741_v14 = vmul.f32 %v1055_v10, %v736_v5  ;;  %vm746_vm4 = vweird.f32 %v1055_v10 }
 0x1a3   : > { %v1059_v15 = vpop.eup %1058  ;;  %v756_v16 = vmul.f32 %v1057_v13, %v737_v8  ;;  %1060 = vrcp.f32 %v738_v11  ;;  %vm761_vm5 = vweird.f32 %v1057_v13  ;;  %vm747_vm7 = vmor %vm745_vm6, %vm746_vm4  ;;  %v781_v37 = vand.u32 2147483648, %v738_v11 }
 0x1a4   : > { %v742_v17 = vsub.f32 1.0, %v741_v14  ;;  %v739_v18 = vadd.f32 1.0, %v1059_v15  ;;  %vm762_vm10 = vmor %vm760_vm8, %vm761_vm5  ;;  %v779_v40 = vand.u32 2147483647, %v738_v11  ;;  %vm775_vm13 = vweird.f32 %v738_v11 }
 0x1a5   : > { %v757_v20 = vsub.f32 1.0, %v756_v16 }
 0x1a6   : > { %v743_v21 = vmul.f32 %v1055_v10, %v742_v17  ;;  %1062 = vrcp.f32 %v739_v18  ;;  %v796_v43 = vand.u32 2147483648, %v739_v18  ;;  %v794_v44 = vand.u32 2147483647, %v739_v18 }
 0x1a7   : > { %v758_v24 = vmul.f32 %v1057_v13, %v757_v20  ;;  %vm780_vm0 = vcmp.eq.f32.partialorder %v779_v40, 8.507059e+37  ;;  %vm790_vm1 = vweird.f32 %v739_v18 }
 0x1a8   : > { %v744_v26 = vadd.f32 %v1055_v10, %v743_v21  ;;  %v797_v48 = vor.u32 1.1754944e-38, %v796_v43  ;;  %vm795_vm3 = vcmp.eq.f32.partialorder %v794_v44, 8.507059e+37 }
 0x1a9   : > { %v1061_v27 = vpop.eup %1060  ;;  %v759_v29 = vadd.f32 %v1057_v13, %v758_v24 }
 0x1aa   : > { %v748_v30 = vsel %vm747_vm7, %v1055_v10, %v744_v26  ;;  %v771_v32 = vmul.f32 %v1061_v27, %v738_v11  ;;  %vm776_vm12 = vweird.f32 %v1061_v27 }
 0x1ab   : > { %v753_v49 = vsel %vm750_vm9, %v752_v12, %v748_v30  ;;  %v763_v33 = vsel %vm762_vm10, %v1057_v13, %v759_v29  ;;  %vm777_vm14 = vmor %vm775_vm13, %vm776_vm12 }
 0x1ac   : > { %v1063_v28 = vpop.eup %1062  ;;  %v768_v23 = vsel %vm765_vm11, %v767_v31, %v763_v33  ;;  %v800_v34 = vmul.f32 %v753_v49, %v1438_v0  ;;  %v772_v35 = vsub.f32 1.0, %v771_v32  ;;  %v782_v0 = vor.u32 1.1754944e-38, %v781_v37 }
 0x1ad   : > { %v801_v36 = vmul.f32 %v768_v23, %v1440_v1  ;;  %v786_v38 = vmul.f32 %v1063_v28, %v739_v18  ;;  %vm791_vm15 = vweird.f32 %v1063_v28 }
 0x1ae   : > { %v773_v39 = vmul.f32 %v1061_v27, %v772_v35  ;;  %804 = vst [vmem:[%s294_s23] sm:$0xff] %v800_v34  ;;  %vm792_vm2 = vmor %vm790_vm1, %vm791_vm15 }
 0x1af   : > { %v787_v41 = vsub.f32 1.0, %v786_v38  ;;  %805 = vst [vmem:[%s294_s23 + $0x8] sm:$0xff] %v801_v36 }
 0x1b0   : > { %v774_v42 = vadd.f32 %v1061_v27, %v773_v39 }
 0x1b1   : > { %v788_v1 = vmul.f32 %v1063_v28, %v787_v41 }
 0x1b2   : > { %v778_v45 = vsel %vm777_vm14, %v1061_v27, %v774_v42 }
 0x1b3   : > { %v783_v46 = vsel %vm780_vm0, %v782_v0, %v778_v45  ;;  %v789_v47 = vadd.f32 %v1063_v28, %v788_v1 }
 0x1b4   : > { %v802_v50 = vmul.f32 %v783_v46, %v1444_v3 }
 0x1b5   : > { %v793_v51 = vsel %vm792_vm2, %v1063_v28, %v789_v47 }
 0x1b6   : > { %v798_v52 = vsel %vm795_vm3, %v797_v48, %v793_v51  ;;  %806 = vst [vmem:[%s294_s23 + $0x10] sm:$0xff] %v802_v50 }
 0x1b7   : > { %v803_v53 = vmul.f32 %v798_v52, %v1446_v4 }
 0x1b9   : > { %807 = vst [vmem:[%s294_s23 + $0x18] sm:$0xff] %v803_v53 }
 0x1ba   : > { %1211 = shalt.err (!%p1208_p10)
}
 0x1bb   : > { %s1270_s26 = smov 256   ;;  %s1271_s29 = smov 16  }
 0x1bc   : > { %966 = dma.vmem_to_hbm [thread:$0]  (%p1390_p3), %s822_s22, 512, %s824_s13, %s809_s12, %s1270_s26, %s1270_s26, %s1271_s29  }
 0x1bd PF: > { %s838_s16 = sand.u32 1, %s1246_s18   ;;  %p1541_p12 = scmp.ge.s32.totalorder %s1258_s21, 2 }
 0x1be   : > { %s839_s23 = scalar_lea.sflag [#allocation4], %s838_s16 }
 0x1bf   : > { %p983_p13 = pnand %p1541_p12, %p1337_p6 }
 0x1c1   : > { %p984_p0 = pneg %p983_p13 }
 0x1c3   : > { %1241 = dma.done.wait (%p984_p0), %s839_s23, 512  }
 0x1c4   : > { %1243 = vsyncadd (%p984_p0), %s839_s23, 4294966784  ;;  %p20_p5 = scmp.ge.s32.totalorder %s1377_s30, 4   ;;  %s1542_s18 = smov %s1250_s19 }
 0x1c5   : > { %s1543_s19 = smov %s1254_s20  ;;  %s1544_s20 = smov %s1386_s9 }
 0x1c6   : > { %s1545_s21 = smov %s1377_s30  ;;  %22 = sbr.rel (!%p20_p5) target bundleno = 7 (0x7), region = 97 }
 0x1cb   :  { %845 = vsyncpa [#allocation3], 1 }
 0x1cc   :  { %847 = vsyncpa [#allocation3 + $0x1], 1 }
 0x1cd   :  { %848 = vsyncpa [#allocation6], 1 }
 0x1ce   :  { %849 = vsyncpa [#allocation9], 1 }
 0x1cf   :  { %850 = vsyncpa [#allocation4], 1 }
 0x1d0   :  { %852 = vsyncpa [#allocation4 + $0x1], 1 }

</bundles_post_ra>
